<compile_context>
chip_gen: v7x
topology: tpu7x:2x2x1
jax: 0.10.0
libtpu: 0.0.40
codegen_flags: <defaults>
</compile_context>

<pallas_src>
import functools

import jax
import jax.numpy as jnp
from jax.experimental import pallas as pl
from jax.experimental.pallas import tpu as pltpu

_MIB = 1024 * 1024


def _row_sum_chunks(hidden_ref, n_rows, inner):
    """f32 sum of hidden_ref[:, :n_rows, :] over axis 1.

    Done in static chunks of `inner` rows so the f32-widened temporaries stay
    a couple of MiB regardless of how large the (bf16) DMA block is.
    """
    acc = None
    start = 0
    while start < n_rows:
        step = min(inner, n_rows - start)
        x = hidden_ref[:, start:start + step, :].astype(jnp.float32)
        part = jnp.sum(x, axis=1)                       # [B, h_tile] f32
        acc = part if acc is None else acc + part
        start += step
    return acc


def _pool_kernel(hidden_ref, sum_ref, *, seq_len, inner):
    """Accumulate sum over the sequence axis into sum_ref ([B, h_tile] f32).

    grid = (n_h, n_s): axis 0 ("parallel") tiles H, axis 1 ("arbitrary")
    reduces over S.  The output index_map ignores the S axis, so sum_ref stays
    resident across the reduction; step 0 writes directly (no zero-then-add).
    """
    s_i = pl.program_id(1)
    n_s = pl.num_programs(1)
    t_s = hidden_ref.shape[1]
    rem = seq_len % t_s                                  # static at trace time

    def _store(partial):
        @pl.when(s_i == 0)
        def _():
            sum_ref[...] = partial

        @pl.when(s_i > 0)
        def _():
            sum_ref[...] += partial

    if rem == 0:
        # No ragged tile (auto tile chooser prefers divisors of S).
        _store(_row_sum_chunks(hidden_ref, t_s, inner))
    else:
        # Ragged last tile: only that step sums the `rem` valid rows via a
        # static slice (no per-element mask); all other steps run the plain sum.
        @pl.when(s_i < n_s - 1)
        def _():
            _store(_row_sum_chunks(hidden_ref, t_s, inner))

        @pl.when(s_i == n_s - 1)
        def _():
            _store(_row_sum_chunks(hidden_ref, rem, inner))


def _choose_tiles(batch, seq, hidden, itemsize, *, target_bytes=12 * _MIB):
    """Pick (s_tile, h_tile).

    h_tile: split H into two 128-aligned chunks when possible so the leading
    "parallel" grid axis can be sharded across v7x's two TensorCores (costs
    nothing on single-core v5e/v6e).
    s_tile: sized so one block is ~12 MiB (amortizes the ~0.35us per-grid-step
    overhead to a few % of DMA even at v7x's 3.2 TB/s while double-buffered
    blocks stay inside v7x's 64 MiB VMEM), preferring a divisor of `seq` so
    there is no ragged last tile.
    """
    h_tile = hidden // 2 if (hidden % 256 == 0) else hidden
    bytes_per_row = max(1, batch * h_tile * itemsize)
    t = max(1, target_bytes // bytes_per_row)
    if t >= seq:
        return seq, h_tile                               # whole sequence fits
    t = max(16, (t // 16) * 16)                          # sublane-friendly
    d = t
    while d >= 16 and 2 * d >= t:                        # prefer divisor of S
        if seq % d == 0:
            return d, h_tile
        d -= 16
    return min(t, seq), h_tile


def _choose_inner(batch, s_tile, h_tile, *, temp_bytes=2 * _MIB):
    """Rows per in-kernel f32 chunk so the widened temp stays ~temp_bytes."""
    inner = temp_bytes // max(1, batch * h_tile * 4)
    inner = max(8, (inner // 8) * 8)
    return min(inner, s_tile)


def mean_pool(hidden_states, *, s_tile=None, h_tile=None):
    """torch.mean(hidden_states, dim=1) as a Pallas kernel. Returns [B, H] f32."""
    B, S, H = hidden_states.shape
    auto_s, auto_h = _choose_tiles(B, S, H, hidden_states.dtype.itemsize)
    s_tile = auto_s if s_tile is None else min(int(s_tile), S)
    h_tile = auto_h if h_tile is None else int(h_tile)
    inner = _choose_inner(B, s_tile, h_tile)

    n_s = pl.cdiv(S, s_tile)
    n_h = pl.cdiv(H, h_tile)

    # VMEM budget: 2x double-buffered input block + chunked f32 temp + output.
    block_bytes = B * s_tile * h_tile * hidden_states.dtype.itemsize
    temp_bytes = B * inner * h_tile * 4
    out_bytes = 2 * B * h_tile * 4
    vmem_limit = 2 * block_bytes + temp_bytes + out_bytes + 2 * _MIB
    vmem_limit = int(min(max(vmem_limit, 16 * _MIB), 48 * _MIB))

    kernel = functools.partial(_pool_kernel, seq_len=S, inner=inner)

    sums = pl.pallas_call(
        kernel,
        out_shape=jax.ShapeDtypeStruct((B, H), jnp.float32),
        grid_spec=pltpu.PrefetchScalarGridSpec(
            num_scalar_prefetch=0,
            grid=(n_h, n_s),
            in_specs=[
                pl.BlockSpec((B, s_tile, h_tile), lambda hb, sb: (0, sb, hb)),
            ],
            out_specs=pl.BlockSpec((B, h_tile), lambda hb, sb: (0, hb)),
        ),
        compiler_params=pltpu.CompilerParams(
            dimension_semantics=("parallel", "arbitrary"),
            vmem_limit_bytes=vmem_limit,
        ),
    )(hidden_states)

    return sums * (1.0 / float(S))


def score_and_loss(hidden_states, weight, bias, labels, *, s_tile=None, h_tile=None):
    """Mean-pool (Pallas) + scorer Linear(H, 2) + cross-entropy (wrapper JAX).

    Returns (logits [B, 2] f32, scalar loss). The [B,2] matmul and CE are a few
    hundred FLOPs; running them in the wrapper keeps the kernel output a
    lane-dense [B, H] slab decomposable across the parallel H grid axis.
    """
    pooled = mean_pool(hidden_states, s_tile=s_tile, h_tile=h_tile)     # [B, H]
    logits = pooled @ weight.astype(jnp.float32) + bias.astype(jnp.float32)
    logp = jax.nn.log_softmax(logits, axis=-1)
    # TODO(synk): torch CrossEntropyLoss ignore_index (-100) rows are not
    # excluded here; labels are assumed to always be valid class ids {0, 1}.
    nll = -jnp.take_along_axis(logp, labels[:, None].astype(jnp.int32), axis=1)
    loss = jnp.mean(nll[:, 0])
    return logits, loss


def model_forward(hidden_states, weight, bias, labels, num_choices, *,
                  s_tile=None, h_tile=None):
    """Mirrors Model.forward from where the backbone produced its last hidden
    states. Returns (loss, preds, preds_cls)."""
    logits, loss = score_and_loss(hidden_states, weight, bias, labels,
                                  s_tile=s_tile, h_tile=h_tile)
    preds_cls = jnp.argmax(logits, axis=1)
    positive_logits = logits[:, 1]
    if num_choices != -1:
        preds = jnp.argmax(positive_logits.reshape(-1, num_choices), axis=1)
    else:
        preds = positive_logits
    return loss, preds, preds_cls


if __name__ == "__main__":
    # TODO(synk): the HF tokenizer + AutoModelForSequenceClassification backbone
    # has no Pallas equivalent; its last hidden states are synthesized here.
    key = jax.random.PRNGKey(0)
    k_h, k_w, k_b, k_h2 = jax.random.split(key, 4)

    B, S, H = 4, 40, 128          # 'tiny' checkpoint -> hidden_size = 128
    num_choices = 2

    hidden_states = jax.random.normal(k_h, (B, S, H),
                                      dtype=jnp.float32).astype(jnp.bfloat16)
    weight = jax.random.normal(k_w, (H, 2), dtype=jnp.float32) * 0.02
    bias = jax.random.normal(k_b, (2,), dtype=jnp.float32) * 0.02
    labels = jnp.array([0, 1, 1, 0], dtype=jnp.int32)

    # (1) forced small S-tile: exercises the (parallel, arbitrary) grid and the
    #     ragged last tile (40 % 16 == 8) via the static-slice last-step path.
    loss, preds, preds_cls = model_forward(hidden_states, weight, bias, labels,
                                           num_choices, s_tile=16)
    # (2) auto tiles (whole sequence fits one block at these shapes).
    loss_auto, _, preds_cls_auto = model_forward(hidden_states, weight, bias,
                                                 labels, num_choices)
    jax.block_until_ready((loss, preds, preds_cls, loss_auto, preds_cls_auto))

    # pure-JAX reference
    pooled_ref = jnp.mean(hidden_states.astype(jnp.float32), axis=1)
    logits_ref = pooled_ref @ weight + bias
    logp_ref = jax.nn.log_softmax(logits_ref, axis=-1)
    loss_ref = -jnp.mean(logp_ref[jnp.arange(B), labels])
    assert jnp.allclose(loss, loss_ref, atol=1e-4, rtol=1e-4), (loss, loss_ref)
    assert jnp.allclose(loss_auto, loss_ref, atol=1e-4, rtol=1e-4), (loss_auto, loss_ref)
    assert jnp.array_equal(preds_cls, jnp.argmax(logits_ref, axis=1))
    assert jnp.array_equal(preds_cls_auto, jnp.argmax(logits_ref, axis=1))

    # (3) exercise the split-H parallel axis (n_h = 2) with a second small case.
    B2, S2, H2 = 2, 24, 256
    hs2 = jax.random.normal(k_h2, (B2, S2, H2),
                            dtype=jnp.float32).astype(jnp.bfloat16)
    pooled2 = mean_pool(hs2, s_tile=16)
    jax.block_until_ready(pooled2)
    pooled2_ref = jnp.mean(hs2.astype(jnp.float32), axis=1)
    assert jnp.allclose(pooled2, pooled2_ref, atol=1e-4, rtol=1e-4)

    print("KERNEL_OK")
</pallas_src>

<mosaic_0001>
module attributes {stable_mosaic.version = 11 : i64} {
  func.func @_pool_kernel(%arg0: i32, %arg1: i32, %arg2: memref<4x16x128xbf16, #tpu.memory_space<vmem>>, %arg3: memref<4x128xf32, #tpu.memory_space<vmem>>) attributes {dimension_semantics = [#tpu.dimension_semantics<parallel>, #tpu.dimension_semantics<arbitrary>], iteration_bounds = array<i64: 1, 3>, scalar_prefetch = 0 : i64, scratch_operands = 0 : i64, tpu.core_type = #tpu.core_type<tc>, window_params = [{transform_indices = @transform_0, window_bounds = array<i64: 4, 16, 128>}, {transform_indices = @transform_1, window_bounds = array<i64: 4, 128>}]} {
    %c2_i32 = arith.constant 2 : i32
    %0 = arith.cmpi slt, %arg1, %c2_i32 : i32
    %1 = arith.extui %0 : i1 to i32
    %c0_i32 = arith.constant 0 : i32
    %2 = arith.cmpi ne, %1, %c0_i32 : i32
    scf.if %2 {
      %c0 = arith.constant 0 : index
      %c0_2 = arith.constant 0 : index
      %c0_3 = arith.constant 0 : index
      %6 = vector.load %arg2[%c0, %c0_2, %c0_3] : memref<4x16x128xbf16, #tpu.memory_space<vmem>>, vector<4x16x128xbf16>
      %7 = arith.extf %6 : vector<4x16x128xbf16> to vector<4x16x128xf32>
      %cst = arith.constant dense<0.000000e+00> : vector<4x128xf32>
      %8 = vector.multi_reduction <add>, %7, %cst [1] : vector<4x16x128xf32> to vector<4x128xf32>
      %c0_i32_4 = arith.constant 0 : i32
      %9 = arith.cmpi eq, %arg1, %c0_i32_4 : i32
      %10 = arith.extui %9 : i1 to i32
      %c0_i32_5 = arith.constant 0 : i32
      %11 = arith.cmpi ne, %10, %c0_i32_5 : i32
      scf.if %11 {
        %c0_8 = arith.constant 0 : index
        %c0_9 = arith.constant 0 : index
        %15 = vector.load %arg3[%c0_8, %c0_9] : memref<4x128xf32, #tpu.memory_space<vmem>>, vector<4x128xf32>
        tpu.vector_store %arg3[%c0_8, %c0_9], %8 {strides = array<i32>} : memref<4x128xf32, #tpu.memory_space<vmem>>, vector<4x128xf32>,
      } else {
      }
      %c0_i32_6 = arith.constant 0 : i32
      %12 = arith.cmpi sgt, %arg1, %c0_i32_6 : i32
      %13 = arith.extui %12 : i1 to i32
      %c0_i32_7 = arith.constant 0 : i32
      %14 = arith.cmpi ne, %13, %c0_i32_7 : i32
      scf.if %14 {
        %c0_8 = arith.constant 0 : index
        %c0_9 = arith.constant 0 : index
        %15 = vector.load %arg3[%c0_8, %c0_9] : memref<4x128xf32, #tpu.memory_space<vmem>>, vector<4x128xf32>
        %16 = arith.addf %15, %8 : vector<4x128xf32>
        %c0_10 = arith.constant 0 : index
        %c0_11 = arith.constant 0 : index
        %17 = vector.load %arg3[%c0_10, %c0_11] : memref<4x128xf32, #tpu.memory_space<vmem>>, vector<4x128xf32>
        tpu.vector_store %arg3[%c0_10, %c0_11], %16 {strides = array<i32>} : memref<4x128xf32, #tpu.memory_space<vmem>>, vector<4x128xf32>,
      } else {
      }
    } else {
    }
    %c2_i32_0 = arith.constant 2 : i32
    %3 = arith.cmpi eq, %arg1, %c2_i32_0 : i32
    %4 = arith.extui %3 : i1 to i32
    %c0_i32_1 = arith.constant 0 : i32
    %5 = arith.cmpi ne, %4, %c0_i32_1 : i32
    scf.if %5 {
      %c0 = arith.constant 0 : index
      %c0_2 = arith.constant 0 : index
      %c0_3 = arith.constant 0 : index
      %6 = vector.load %arg2[%c0, %c0_2, %c0_3] : memref<4x16x128xbf16, #tpu.memory_space<vmem>>, vector<4x8x128xbf16>
      %7 = arith.extf %6 : vector<4x8x128xbf16> to vector<4x8x128xf32>
      %cst = arith.constant dense<0.000000e+00> : vector<4x128xf32>
      %8 = vector.multi_reduction <add>, %7, %cst [1] : vector<4x8x128xf32> to vector<4x128xf32>
      %c0_i32_4 = arith.constant 0 : i32
      %9 = arith.cmpi eq, %arg1, %c0_i32_4 : i32
      %10 = arith.extui %9 : i1 to i32
      %c0_i32_5 = arith.constant 0 : i32
      %11 = arith.cmpi ne, %10, %c0_i32_5 : i32
      scf.if %11 {
        %c0_8 = arith.constant 0 : index
        %c0_9 = arith.constant 0 : index
        %15 = vector.load %arg3[%c0_8, %c0_9] : memref<4x128xf32, #tpu.memory_space<vmem>>, vector<4x128xf32>
        tpu.vector_store %arg3[%c0_8, %c0_9], %8 {strides = array<i32>} : memref<4x128xf32, #tpu.memory_space<vmem>>, vector<4x128xf32>,
      } else {
      }
      %c0_i32_6 = arith.constant 0 : i32
      %12 = arith.cmpi sgt, %arg1, %c0_i32_6 : i32
      %13 = arith.extui %12 : i1 to i32
      %c0_i32_7 = arith.constant 0 : i32
      %14 = arith.cmpi ne, %13, %c0_i32_7 : i32
      scf.if %14 {
        %c0_8 = arith.constant 0 : index
        %c0_9 = arith.constant 0 : index
        %15 = vector.load %arg3[%c0_8, %c0_9] : memref<4x128xf32, #tpu.memory_space<vmem>>, vector<4x128xf32>
        %16 = arith.addf %15, %8 : vector<4x128xf32>
        %c0_10 = arith.constant 0 : index
        %c0_11 = arith.constant 0 : index
        %17 = vector.load %arg3[%c0_10, %c0_11] : memref<4x128xf32, #tpu.memory_space<vmem>>, vector<4x128xf32>
        tpu.vector_store %arg3[%c0_10, %c0_11], %16 {strides = array<i32>} : memref<4x128xf32, #tpu.memory_space<vmem>>, vector<4x128xf32>,
      } else {
      }
    } else {
    }
    return
  }
  func.func @transform_0(%arg0: i32, %arg1: i32) -> (i32, i32, i32) {
    %c0_i32 = arith.constant 0 : i32
    %c0_i32_0 = arith.constant 0 : i32
    return %c0_i32, %arg1, %arg0 : i32, i32, i32
  }
  func.func @transform_1(%arg0: i32, %arg1: i32) -> (i32, i32) {
    %c0_i32 = arith.constant 0 : i32
    %c0_i32_0 = arith.constant 0 : i32
    return %c0_i32, %arg0 : i32, i32
  }
}

</mosaic_0001>

<bundles_post_ra>
// kernel: tpu_custom_call.1
= control target key start
LH: loop header
LB: loop body
LE: loop exit
PB: predicated region body
PF: predicated region fallthrough
CT: control target
= control target key end

     0   :  { %6 = vsyncpa [#allocation3], 0  ;;  %s733_s0 = inlined_call_operand.hbm [shape: bf16[4,40,128], index: 0, kind: input, shape index: {}]   ;;  %s734_s1 = inlined_call_operand.hbm [shape: f32[4,128], index: 1, kind: output, shape index: {}]  }
   0x1   :  { %8 = vsyncpa [#allocation3 + $0x1], 0 }
   0x2   :  { %9 = vsyncpa [#allocation4], 0  ;;  %s610_s6 = smov 0   ;;  %s612_s7 = smov 0  }
   0x3   :  { %s614_s8 = smov 0   ;;  %s616_s9 = smov 0  }
   0x4   :  { %s618_s10 = smov 0   ;;  %s620_s11 = smov 0  }
   0x5 LB: > { %s404_s12 = sadd.s32 4294967295, %s592_s11   ;;  %s24_s13 = sadd.s32 1, %s588_s10  ;;  %s592_s11 = sphi %s620_s11, %s15_s11   ;;  %s588_s10 = sphi %s618_s10, %s741_s10   ;;  %s584_s9 = sphi %s616_s9, %s740_s9   ;;  %s580_s8 = sphi %s614_s8, %s739_s8   ;;  %s576_s7 = sphi %s612_s7, %s738_s7   ;;  %s572_s6 = sphi %s610_s6, %s737_s6  }
   0x6   : > { %p25_p0 = scmp.ge.s32.totalorder %s24_s13, 3  ;;  %s36_s14 = sadd.s32 1, %s580_s8 }
   0x7   : > { %p43_p1 = scmp.ne.s32.totalorder %s580_s8, %s576_s7  ;;  %p44_p2 = scmp.eq.s32.totalorder %s592_s11, 0 }
   0x8   : > { %s743_s13 = smov (%p25_p0, %s24_s13), 0  ;;  %p49_p4 = scmp.ne.s32.totalorder %s576_s7, %s572_s6 }
   0x9   : > { %p45_p3 = por %p44_p2, %p43_p1  ;;  %s31_s15 = ssub.s32 %s588_s10, %s743_s13 }
   0xa   : > { %p50_p5 = scmp.eq.s32.totalorder %s404_s12, 0  ;;  %p34_p6 = scmp.eq.s32.totalorder %s31_s15, 0 }
   0xb   : > { %p406_p8 = scmp.ge.s32.totalorder %s592_s11, 3 }
   0xc   : > { %p651_p7 = por %p50_p5, %p49_p4 }
   0xd   : > { %s656_s17 = scalar_select %p34_p6, %s580_s8, %s36_s14  }
   0xe   : > { %95 = sbr.rel (%p406_p8) target bundleno = 45 (0x2d), region = 16 }
  0x15   : > { %98 = sbr.rel (!%p45_p3) target bundleno = 45 (0x2d), region = 20 }
  0x1c   : > { %s99_s18 = sand.u32 1, %s580_s8   ;;  %s408_s19 = sshll.u32 %s588_s10, 1 }
  0x1d   : > { %s407_s20 = sshll.u32 %s99_s18, 5  ;;  %s105_s21 = ssub.s32 5, %s408_s19 }
  0x1e   : > { %p106_p9 = scmp.lt.s32.totalorder %s105_s21, 2  ;;  %s100_s24 = scalar_lea.sflag [#allocation3], %s99_s18 }
  0x1f   : > { %s103_s25 = scalar_lea.vmem [#allocation2], %s407_s20 }
  0x20   : > { %s745_s21 = smov (!%p106_p9, %s105_s21), 2 }
  0x21   : > { %s409_s22 = sshll.u32 %s745_s21, 8 }
  0x22   : > { %s110_s23 = ssub.s32 512, %s409_s22 }
  0x23   : > { %111 = vsyncadd %s100_s24, %s110_s23  ;;  %p410_p10 = scmp.ne.s32.totalorder %s409_s22, 0  ;;  %s429_s26 = sshll.u32 %s588_s10, 7 }
  0x24   : > { %s115_s29 = scalar_lea.hbm %s733_s0, %s429_s26  ;;  %s122_s30 = sld [smem:[#allocation0]]  }
  0x25   : > { %s130_s2 = sshll.u32 %s103_s25, 4  ;;  %s594_s3 = smov 320   ;;  %s131_s2 = int_to_ptr.vmem [resolvable:$true] %s130_s2 }
  0x26   : > { %137 = sst [smem:[#allocation7]] %s594_s3  ;;  %s595_s4 = smov 128  }
  0x27   : > { %141 = sst [smem:[#allocation7 + $0x2]] %s745_s21  ;;  %s596_s5 = smov 64  }
  0x28   : > { %139 = sst [smem:[#allocation7 + $0x1]] %s595_s4  ;;  %s597_s15 = smov 4  }
  0x29   : > { %143 = sst [smem:[#allocation7 + $0x3]] %s596_s5  ;;  %s598_s18 = smov [#allocation6]  }
  0x2a   : > { %s414_s6 = sshll.u32 %s122_s30, 26  ;;  %145 = sst [smem:[#allocation7 + $0x4]] %s596_s5 }
  0x2b   : > { %s415_s14 = sadd.s32 134217728, %s414_s6  ;;  %147 = sst [smem:[#allocation7 + $0x5]] %s597_s15 }
  0x2c   : > { %149 = dma.general (%p410_p10), %s115_s29, %s409_s22, %s131_s2, %s100_s24, %s598_s18, [#allocation7], %s415_s14, 0  }
  0x2d PF: > { %p417_p11 = scmp.ge.s32.totalorder %s592_s11, 1  ;;  %p151_p12 = scmp.lt.s32.totalorder %s592_s11, 4 }
  0x2f   : > { %p152_p13 = pnand %p417_p11, %p151_p12 }
  0x30   : > { %s157_s19 = sand.u32 (!%p152_p13), 1, %s576_s7  }
  0x31   : > { %155 = sbr.rel (%p152_p13) target bundleno = 144 (0x90), region = 24  ;;  %s418_s20 = sshll.u32 (!%p152_p13), %s157_s19, 5 }
  0x32   : > { %s158_s21 = scalar_lea.sflag (!%p152_p13), [#allocation3], %s157_s19  ;;  %s669_s23 = scalar_lea.vmem (!%p152_p13), [#allocation2], %s418_s20 }
  0x38   : > { %563 = dma.done.wait (%p651_p7), %s158_s21, 512  }
  0x39   : > { %565 = vsyncadd (%p651_p7), %s158_s21, 4294966784  ;;  %p419_p0 = scmp.ge.s32.totalorder %s584_s9, 2 }
  0x3a   : > { %v433_v0 = vld [vmem:[%s669_s23] sm:$0xff] (!%p419_p0)   ;;  %v448_v1 = vld [vmem:[%s669_s23 + $0x8] sm:$0xff] (!%p419_p0)   ;;  %v449_v2 = vld [vmem:[%s669_s23 + $0x10] sm:$0xff] (!%p419_p0)   ;;  %p420_p1 = scmp.ne.s32.totalorder (!%p419_p0), %s584_s9, 0 }
  0x3b   : > { %183 = sbr.rel (%p419_p0) target bundleno = 89 (0x59), region = 32  ;;  %v434_v3 = vunpack.c.l.bf16 (!%p419_p0), %v433_v0  ;;  %v435_v4 = vunpack.c.h.bf16 (!%p419_p0), %v433_v0  ;;  %v438_v5 = vunpack.c.l.bf16 (!%p419_p0), %v448_v1  ;;  %v439_v6 = vunpack.c.h.bf16 (!%p419_p0), %v448_v1  ;;  %v450_v7 = vld [vmem:[%s669_s23 + $0x18] sm:$0xff] (!%p419_p0)  }
  0x3c   : > { %v442_v8 = vunpack.c.l.bf16 (!%p419_p0), %v449_v2  ;;  %v443_v9 = vunpack.c.h.bf16 (!%p419_p0), %v449_v2  ;;  %v446_v10 = vunpack.c.l.bf16 (!%p419_p0), %v450_v7  ;;  %v447_v11 = vunpack.c.h.bf16 (!%p419_p0), %v450_v7 }
  0x3d   : > { %v200_v12 = vadd.f32 (!%p419_p0), %v435_v4, %v434_v3  ;;  %v207_v13 = vadd.f32 (!%p419_p0), %v439_v6, %v438_v5 }
  0x3e   : > { %v214_v14 = vadd.f32 (!%p419_p0), %v443_v9, %v442_v8  ;;  %v221_v15 = vadd.f32 (!%p419_p0), %v447_v11, %v446_v10 }
  0x3f   : > { %v201_v16 = vrot.slane (!%p419_p0), %v200_v12, 4  ;;  %v208_v17 = vrot.slane (!%p419_p0), %v207_v13, 4 }
  0x40   : > { %v215_v18 = vrot.slane (!%p419_p0), %v214_v14, 4  ;;  %v222_v19 = vrot.slane (!%p419_p0), %v221_v15, 4 }
  0x41   : > { %v202_v20 = vadd.f32 (!%p419_p0), %v201_v16, %v200_v12  ;;  %v209_v21 = vadd.f32 (!%p419_p0), %v208_v17, %v207_v13 }
  0x42   : > { %v216_v22 = vadd.f32 %v215_v18, %v214_v14  ;;  %v223_v23 = vadd.f32 %v222_v19, %v221_v15  ;;  %vm236_vm0 = vcmask (!%p420_p1), 1041409   ;;  %vm238_vm1 = vcmask (!%p420_p1), 1042434  }
  0x43   : > { %v203_v24 = vrot.slane %v202_v20, 2  ;;  %v210_v25 = vrot.slane %v209_v21, 2  ;;  %vm240_vm2 = vcmask (!%p420_p1), 1043459  }
  0x44   : > { %v217_v26 = vrot.slane %v216_v22, 2  ;;  %v224_v27 = vrot.slane %v223_v23, 2  ;;  %231 = sbr.rel (%p420_p1) target bundleno = 79 (0x4f), region = 36 }
  0x45   : > { %v204_v28 = vadd.f32 %v203_v24, %v202_v20  ;;  %v211_v29 = vadd.f32 %v210_v25, %v209_v21 }
  0x46   : > { %v218_v30 = vadd.f32 %v217_v26, %v216_v22  ;;  %v225_v31 = vadd.f32 %v224_v27, %v223_v23 }
  0x47   : > { %v205_v32 = vrot.slane %v204_v28, 1  ;;  %v212_v33 = vrot.slane %v211_v29, 1 }
  0x48   : > { %v219_v34 = vrot.slane %v218_v30, 1  ;;  %v226_v35 = vrot.slane %v225_v31, 1 }
  0x49   : > { %v206_v36 = vadd.f32 %v205_v32, %v204_v28  ;;  %v213_v37 = vadd.f32 %v212_v33, %v211_v29 }
  0x4a   : > { %v220_v38 = vadd.f32 %v219_v34, %v218_v30  ;;  %v227_v39 = vadd.f32 %v226_v35, %v225_v31 }
  0x4b   : > { %v237_v40 = vsel %vm236_vm0, %v213_v37, %v206_v36 }
  0x4c   : > { %v239_v41 = vsel %vm238_vm1, %v220_v38, %v237_v40 }
  0x4d   : > { %v241_v42 = vsel %vm240_vm2, %v227_v39, %v239_v41 }
  0x4e   : > { %243 = vst [vmem:[#allocation5] sm:$0xf] %v241_v42 }
  0x4f PF: > { %p421_p2 = scmp.le.s32.totalorder %s584_s9, 0 }
  0x50   : > { %vm253_vm3 = vcmask (!%p421_p2), 1041409   ;;  %vm255_vm4 = vcmask (!%p421_p2), 1042434   ;;  %vm257_vm5 = vcmask (!%p421_p2), 1043459  }
  0x51   : > { %247 = sbr.rel (%p421_p2) target bundleno = 89 (0x59), region = 40  ;;  %v254_v44 = vsel (!%p421_p2), %vm253_vm3, %v213_v37, %v206_v36 }
  0x52   : > { %v256_v45 = vsel (!%p421_p2), %vm255_vm4, %v220_v38, %v254_v44 }
  0x53   : > { %v258_v46 = vsel (!%p421_p2), %vm257_vm5, %v227_v39, %v256_v45 }
  0x55   : > { %v248_v43 = vld [vmem:[#allocation5] sm:$0xf] (!%p421_p2) }
  0x56   : > { %v260_v47 = vadd.f32 (!%p421_p2), %v258_v46, %v248_v43 }
  0x58   : > { %261 = vst [vmem:[#allocation5] sm:$0xf] %v260_v47 }
  0x59 PF: > { %p422_p3 = scmp.ne.s32.totalorder %s584_s9, 2 }
  0x5a   : > { %v266_v48 = vld [vmem:[%s669_s23] ss:$8 sps:$4 sm:$0xff] (!%p422_p3)   ;;  %v268_v49 = vld [vmem:[%s669_s23 + $0x10] ss:$8 sps:$4 sm:$0xff] (!%p422_p3)   ;;  %p423_p4 = scmp.ne.s32.totalorder (!%p422_p3), %s584_s9, 0 }
  0x5b   : > { %265 = sbr.rel (%p422_p3) target bundleno = 119 (0x77), region = 44  ;;  %v270_v50 = vunpack.c.l.bf16 (!%p422_p3), %v266_v48  ;;  %v271_v51 = vunpack.c.h.bf16 (!%p422_p3), %v266_v48  ;;  %v272_v52 = vunpack.c.l.bf16 (!%p422_p3), %v268_v49  ;;  %v273_v53 = vunpack.c.h.bf16 (!%p422_p3), %v268_v49 }
  0x5d   : > { %v274_v54 = vrot.slane (!%p422_p3), %v270_v50, 4  ;;  %v280_v55 = vrot.slane (!%p422_p3), %v271_v51, 4  ;;  %v286_v56 = vrot.slane (!%p422_p3), %v272_v52, 4  ;;  %v292_v57 = vrot.slane (!%p422_p3), %v273_v53, 4 }
  0x5f   : > { %v275_v58 = vadd.f32 (!%p422_p3), %v274_v54, %v270_v50  ;;  %v281_v59 = vadd.f32 (!%p422_p3), %v280_v55, %v271_v51  ;;  %v287_v60 = vadd.f32 (!%p422_p3), %v286_v56, %v272_v52  ;;  %v293_v61 = vadd.f32 (!%p422_p3), %v292_v57, %v273_v53 }
  0x61   : > { %v276_v62 = vrot.slane (!%p422_p3), %v275_v58, 2  ;;  %v282_v63 = vrot.slane (!%p422_p3), %v281_v59, 2  ;;  %v288_v0 = vrot.slane (!%p422_p3), %v287_v60, 2  ;;  %v294_v1 = vrot.slane (!%p422_p3), %v293_v61, 2 }
  0x62   : > { %301 = sbr.rel (%p423_p4) target bundleno = 109 (0x6d), region = 48  ;;  %vm306_vm6 = vcmask (!%p423_p4), 1041409   ;;  %vm308_vm7 = vcmask (!%p423_p4), 1042434   ;;  %vm310_vm8 = vcmask (!%p423_p4), 1043459  }
  0x63   : > { %v277_v2 = vadd.f32 %v276_v62, %v275_v58  ;;  %v283_v3 = vadd.f32 %v282_v63, %v281_v59  ;;  %v289_v4 = vadd.f32 %v288_v0, %v287_v60  ;;  %v295_v5 = vadd.f32 %v294_v1, %v293_v61 }
  0x65   : > { %v278_v6 = vrot.slane %v277_v2, 1  ;;  %v284_v7 = vrot.slane %v283_v3, 1  ;;  %v290_v8 = vrot.slane %v289_v4, 1  ;;  %v296_v9 = vrot.slane %v295_v5, 1 }
  0x67   : > { %v279_v10 = vadd.f32 %v278_v6, %v277_v2  ;;  %v285_v11 = vadd.f32 %v284_v7, %v283_v3  ;;  %v291_v12 = vadd.f32 %v290_v8, %v289_v4  ;;  %v297_v13 = vadd.f32 %v296_v9, %v295_v5 }
  0x69   : > { %v307_v14 = vsel %vm306_vm6, %v285_v11, %v279_v10 }
  0x6a   : > { %v309_v15 = vsel %vm308_vm7, %v291_v12, %v307_v14 }
  0x6b   : > { %v311_v16 = vsel %vm310_vm8, %v297_v13, %v309_v15 }
  0x6c   : > { %313 = vst [vmem:[#allocation5] sm:$0xf] %v311_v16 }
  0x6d PF: > { %p424_p5 = scmp.le.s32.totalorder %s584_s9, 0 }
  0x6e   : > { %vm323_vm9 = vcmask (!%p424_p5), 1041409   ;;  %vm325_vm10 = vcmask (!%p424_p5), 1042434   ;;  %vm327_vm11 = vcmask (!%p424_p5), 1043459  }
  0x6f   : > { %317 = sbr.rel (%p424_p5) target bundleno = 119 (0x77), region = 52  ;;  %v324_v18 = vsel (!%p424_p5), %vm323_vm9, %v285_v11, %v279_v10 }
  0x70   : > { %v326_v19 = vsel (!%p424_p5), %vm325_vm10, %v291_v12, %v324_v18 }
  0x71   : > { %v328_v20 = vsel (!%p424_p5), %vm327_vm11, %v297_v13, %v326_v19 }
  0x73   : > { %v318_v17 = vld [vmem:[#allocation5] sm:$0xf] (!%p424_p5) }
  0x74   : > { %v330_v21 = vadd.f32 (!%p424_p5), %v328_v20, %v318_v17 }
  0x76   : > { %331 = vst [vmem:[#allocation5] sm:$0xf] %v330_v21 }
  0x77 PF: > { %p689_p6 = scmp.eq.s32.totalorder %s404_s12, 2  ;;  %s599_s9 = smov [#allocation5]  }
  0x78   : > { %s341_s22 = sshll.u32 %s599_s9, 4  ;;  %s342_s22 = int_to_ptr.vmem [resolvable:$true] %s341_s22 }
  0x79   : > { %s512_s24 = scalar_lea.vmem %s342_s22, 64  ;;  %p519_p10 = scmp.lt.s32.totalorder %s342_s22, %s342_s22 }
  0x7a   : > { %p513_p7 = scmp.ne.s32.totalorder %s342_s22, %s512_s24  ;;  %p520_p11 = scmp.lt.s32.totalorder %s512_s24, %s512_s24 }
  0x7c   : > { %p514_p8 = pnand %p513_p7, %p689_p6  ;;  %p521_p12 = por %p520_p11, %p519_p10 }
  0x7e   : > { %p515_p9 = pneg %p514_p8 }
  0x80   : > { %p522_p13 = pnand %p521_p12, %p515_p9 }
  0x82   : > { %525 = shalt.err (!%p522_p13)
}
  0x83   : > { %s526_s12 = scalar_lea.hbm %s734_s1, 64 }
  0x84   : > { %p527_p0 = scmp.ne.s32.totalorder %s734_s1, %s526_s12  ;;  %p532_p3 = scmp.lt.u32.totalorder %s526_s12, %s734_s1 }
  0x86   : > { %p528_p1 = pnand %p527_p0, %p689_p6 }
  0x88   : > { %p529_p2 = pneg %p528_p1 }
  0x8a   : > { %p534_p4 = pnand %p532_p3, %p529_p2 }
  0x8c   : > { %537 = shalt.err (!%p534_p4)
}
  0x8d   : > { %453 = dma.vmem_to_hbm [thread:$0]  (%p689_p6), %s342_s22, 64, %s734_s1, [#allocation4]  }
  0x8e   : > { %567 = dma.done.wait (%p689_p6), [#allocation4], 64  }
  0x8f   : > { %569 = vsyncadd (%p689_p6), [#allocation4], 4294967232 }
  0x90 PF: > { %s15_s11 = sadd.s32 1, %s592_s11   ;;  %s737_s6 = smov %s576_s7 }
  0x91   : > { %p12_p5 = scmp.ge.s32.totalorder %s15_s11, 5   ;;  %s738_s7 = smov %s580_s8 }
  0x92   : > { %s739_s8 = smov %s656_s17  ;;  %s740_s9 = smov %s588_s10 }
  0x93   : > { %s741_s10 = smov %s743_s13  ;;  %14 = sbr.rel (!%p12_p5) target bundleno = 5 (0x5), region = 91 }
  0x9a   :  { %354 = vsyncpa [#allocation3], 1 }
  0x9b   :  { %356 = vsyncpa [#allocation3 + $0x1], 1 }
  0x9c   :  { %357 = vsyncpa [#allocation4], 1 }
  0x9d   :  { %359 = vsyncpa [#allocation4 + $0x1], 1 }

</bundles_post_ra>
